<compile_context>
chip_gen: v6e
topology: v6e:2x2x1
jax: 0.10.0
libtpu: 0.0.40
codegen_flags: <defaults>
</compile_context>

<pallas_src>
import jax
import jax.numpy as jnp
import numpy as np
from jax.experimental import pallas as pl
from jax.experimental.pallas import tpu as pltpu

LANE = 128      # TPU lane width
SUB_F32 = 8     # f32 sublane quantum
SUB_BF16 = 16   # bf16 sublane quantum (sub-32-bit packs along sublanes)


def _round_up(x, m):
    return ((x + m - 1) // m) * m


# ----------------------------- Pallas kernel ----------------------------------
def _make_mlp_kernel(layer_meta, model_output):
    """layer_meta: static tuple of (row_offset, n_rows, activation) per layer."""

    def kernel(x_ref, w_ref, b_ref, o_ref):
        # x_ref: (TILE_B, F_pad) bf16 activations; w_ref: (R, 128) bf16 packed weights;
        # b_ref: (8, 128) f32 packed biases; o_ref: (TILE_B, model_output) f32 output.
        h = x_ref[...]                                         # bf16
        for i, (off, rows, act) in enumerate(layer_meta):
            w = w_ref[off:off + rows, :]                       # static view -> (rows, 128)
            z = jnp.dot(h, w, preferred_element_type=jnp.float32) + b_ref[i:i + 1, :]
            if act == "relu":
                h = jnp.maximum(z, 0.0).astype(jnp.bfloat16)   # back to bf16 for next dot
            else:                                              # sigmoid head: EUP exp + EUP rcp
                h = pl.reciprocal(1.0 + jnp.exp(-z), approx=True)
        o_ref[...] = h[:, :model_output].astype(o_ref.dtype)   # narrow writeback

    return kernel


# ------------------------------ Weight packing ---------------------------------
def pack_params(params, seq_len=None):
    """Fold Conv1d (if input_3d) into a Toeplitz first layer built against the native
    row-major (B, L*D) input layout, then pack all weights into one bf16 (R,128) slab
    and all biases into one f32 (8,128) slab (single DMA each, VMEM-resident)."""
    weights, biases, acts = [], [], []
    if params["input_3d"]:
        assert seq_len is not None
        depth = params["depth"]
        K = depth
        L = seq_len
        Lout = L + 2 - K + 1                                   # Conv1d padding=1
        assert Lout == params["model_input"], "conv output length must equal model_input"
        cw = np.asarray(params["conv_w"], np.float32)[0]       # (depth, K)
        # x2d[b, l*depth + c] == x[b, l, c].  Conv out[t] = sum_{c,k} w[c,k]*xpad[c, t+k],
        # padded position p = t+k maps to true position l = p-1; taps on the zero padding
        # are dropped (zero rows), so no wrapper-side transpose/pad is needed.
        T = np.zeros((L * depth, Lout), np.float32)
        for t in range(Lout):
            for k in range(K):
                l = t + k - 1
                if 0 <= l < L:
                    for c in range(depth):
                        T[l * depth + c, t] = cw[c, k]
        weights.append(T)
        biases.append(np.full((Lout,), float(np.asarray(params["conv_b"])[0]), np.float32))
        acts.append("relu")
    n_lin = len(params["linears"])
    for i, (w, b) in enumerate(params["linears"]):
        weights.append(np.asarray(w, np.float32).T)            # torch (out,in) -> (in,out)
        biases.append(np.asarray(b, np.float32))
        acts.append("sigmoid" if i == n_lin - 1 else "relu")

    n = len(weights)
    b_slab = np.zeros((_round_up(n, SUB_F32), LANE), np.float32)
    secs, meta, row = [], [], 0
    for i, (w, b) in enumerate(zip(weights, biases)):
        kin, kout = w.shape
        assert kout <= LANE
        # First section matches the padded input width; hidden activations live at 128
        # lanes.  Row offsets stay multiples of 16 so bf16 slab slices are tile-aligned.
        # TODO(synk): on v5e, if still MXU-limited after bf16, store hidden sections at
        # round_up(true_in, 16) rows instead of 128 and slice h accordingly.
        rows = _round_up(kin, SUB_BF16) if i == 0 else LANE
        assert kin <= rows
        sec = np.zeros((rows, LANE), np.float32)
        sec[:kin, :kout] = w
        secs.append(sec)
        b_slab[i, :kout] = b
        meta.append((row, rows, acts[i]))
        row += rows
    return {
        "w_slab": jnp.asarray(np.concatenate(secs, axis=0), dtype=jnp.bfloat16),
        "b_slab": jnp.asarray(b_slab),
        "layer_meta": tuple(meta),
        "in_true": weights[0].shape[0],
        "in_pad": meta[0][1],
        "input_3d": params["input_3d"],
        "model_output": params["model_output"],
    }


# -------------------------------- Forward --------------------------------------
def mlp_pallas_forward(x, packed, *, tile_b=1024):
    """x: (B, L, D) if input_3d else (B, model_input). Returns (B, model_output) f32."""
    B = x.shape[0]
    x2d = x.reshape(B, -1) if packed["input_3d"] else x       # native layout, no transpose
    f_true, f_pad = packed["in_true"], packed["in_pad"]
    assert x2d.shape[1] == f_true
    x2d = x2d.astype(jnp.bfloat16)                             # halve the HBM input stream
    if f_pad != f_true:
        x2d = jnp.pad(x2d, ((0, 0), (0, f_pad - f_true)))

    # Batch tile: large (DMA / per-step-overhead efficiency), bf16-sublane aligned, and
    # guaranteed to yield >=2 grid tiles when the batch allows so both v7x TensorCores
    # get work (harmless on single-TC v5e/v6e).
    tile_b = max(SUB_BF16, _round_up(min(int(tile_b), B), SUB_BF16))
    if B >= 2 * SUB_BF16:
        tile_b = min(tile_b, _round_up((B + 1) // 2, SUB_BF16))
    Bp = _round_up(B, tile_b)
    if Bp != B:
        x2d = jnp.pad(x2d, ((0, Bp - B), (0, 0)))
    n_tiles = Bp // tile_b

    w_slab, b_slab = packed["w_slab"], packed["b_slab"]
    layer_meta = packed["layer_meta"]
    mo = packed["model_output"]
    kernel = _make_mlp_kernel(layer_meta, mo)

    flops = int(2 * Bp * sum(rows * LANE for _, rows, _ in layer_meta))
    bytes_accessed = int(2 * Bp * f_pad          # bf16 input stream
                         + 2 * w_slab.size       # bf16 weight slab (once)
                         + 4 * b_slab.size       # f32 bias slab (once)
                         + 4 * Bp * mo)          # narrow f32 output
    cost = pl.CostEstimate(flops=flops, transcendentals=int(Bp * LANE),
                           bytes_accessed=bytes_accessed)

    out = pl.pallas_call(
        kernel,
        out_shape=jax.ShapeDtypeStruct((Bp, mo), jnp.float32),
        grid=(n_tiles,),
        in_specs=[
            pl.BlockSpec((tile_b, f_pad), lambda i: (i, 0)),   # batch-tiled bf16 input
            # TODO(synk): pipeline_mode=pl.Buffered(1) on the two constant-index specs
            # would drop their redundant second VMEM buffer (tiny, not load-bearing).
            pl.BlockSpec(w_slab.shape, lambda i: (0, 0)),      # VMEM-resident weights
            pl.BlockSpec(b_slab.shape, lambda i: (0, 0)),      # VMEM-resident biases
        ],
        out_specs=pl.BlockSpec((tile_b, mo), lambda i: (i, 0)),  # narrow f32 output block
        compiler_params=pltpu.CompilerParams(
            dimension_semantics=("parallel",),
            vmem_limit_bytes=32 * 1024 * 1024),
        cost_estimate=cost,
    )(x2d, w_slab, b_slab)

    return out[:B]


# --------------------- Deterministic (PyTorch-style) init ----------------------
def init_params(key, model_input, model_output, *, input_3d, depth=4):
    def uniform(k, shape, bound):
        return jax.random.uniform(k, shape, jnp.float32, -bound, bound)

    params = {"input_3d": input_3d, "depth": depth,
              "model_input": model_input, "model_output": model_output}
    keys = jax.random.split(key, 10)
    if input_3d:
        cbound = 1.0 / np.sqrt(depth * depth)                  # fan_in = in_channels * kernel
        params["conv_w"] = uniform(keys[8], (1, depth, depth), cbound)
        params["conv_b"] = uniform(keys[9], (1,), cbound)
        dims = [(model_input, 20), (20, 10), (10, 5), (5, model_output)]
    else:
        dims = [(model_input, 10), (10, 10), (10, 5), (5, model_output)]
    linears = []
    for i, (fi, fo) in enumerate(dims):
        bound = 1.0 / np.sqrt(fi)
        w = uniform(keys[2 * i], (fo, fi), bound)              # torch layout (out, in)
        b = uniform(keys[2 * i + 1], (fo,), bound)
        linears.append((w, b))
    params["linears"] = linears
    return params


# ------------------------------ Pure-JAX reference ------------------------------
def reference_forward(x, params):
    """Mirror of mlp.forward: [permute+conv+relu+flatten] -> relu MLP -> sigmoid (f32)."""
    if params["input_3d"]:
        B, L, D = x.shape
        xn = jnp.pad(jnp.transpose(x, (0, 2, 1)), ((0, 0), (0, 0), (1, 1)))  # (B, D, L+2)
        cw = params["conv_w"][0]                               # (D, K)
        K = cw.shape[1]
        Lout = L + 2 - K + 1
        conv = jnp.zeros((B, Lout), jnp.float32)
        for c in range(D):
            for k in range(K):
                conv = conv + xn[:, c, k:k + Lout] * cw[c, k]
        h = jax.nn.relu(conv + params["conv_b"][0])
    else:
        h = x
    n = len(params["linears"])
    for i, (w, b) in enumerate(params["linears"]):
        z = h @ w.T + b
        h = jax.nn.sigmoid(z) if i == n - 1 else jax.nn.relu(z)
    return h


if __name__ == "__main__":
    key = jax.random.PRNGKey(0)
    k1, k2, k3, k4 = jax.random.split(key, 4)

    # Config 1: input_3d=True (Conv1d front-end). B=2, seq L=17, depth=4, model_output=3.
    B, L, D = 2, 17, 4
    model_input, model_output = L - 1, 3                       # conv output length == model_input
    params3d = init_params(k1, model_input, model_output, input_3d=True, depth=D)
    x3d = jax.random.normal(k2, (B, L, D), dtype=jnp.float32)
    packed3d = pack_params(params3d, seq_len=L)
    y3d = jax.block_until_ready(mlp_pallas_forward(x3d, packed3d))
    ref3d = reference_forward(x3d, params3d)
    assert y3d.shape == (B, model_output)
    np.testing.assert_allclose(np.asarray(y3d), np.asarray(ref3d), rtol=2e-2, atol=2e-2)

    # Config 2: input_3d=False (exact spec); B=300 exercises the 2-tile parallel grid.
    B2, mi2, mo2 = 300, 16, 3
    params2d = init_params(k3, mi2, mo2, input_3d=False)
    x2 = jax.random.normal(k4, (B2, mi2), dtype=jnp.float32)
    packed2d = pack_params(params2d)
    y2 = jax.block_until_ready(mlp_pallas_forward(x2, packed2d))
    ref2 = reference_forward(x2, params2d)
    assert y2.shape == (B2, mo2)
    np.testing.assert_allclose(np.asarray(y2), np.asarray(ref2), rtol=2e-2, atol=2e-2)

    print("KERNEL_OK")
</pallas_src>

<mosaic_0001>
module attributes {stable_mosaic.version = 11 : i64} {
  func.func @kernel(%arg0: i32, %arg1: memref<16x80xbf16, #tpu.memory_space<vmem>>, %arg2: memref<592x128xbf16, #tpu.memory_space<vmem>>, %arg3: memref<8x128xf32, #tpu.memory_space<vmem>>, %arg4: memref<16x3xf32, #tpu.memory_space<vmem>>) attributes {dimension_semantics = [#tpu.dimension_semantics<parallel>], iteration_bounds = array<i64: 1>, scalar_prefetch = 0 : i64, scratch_operands = 0 : i64, tpu.core_type = #tpu.core_type<tc>, window_params = [{transform_indices = @transform_0, window_bounds = array<i64: 16, 80>}, {pipeline_mode = #tpu.pipeline_mode<synchronous>, transform_indices = @transform_1, window_bounds = array<i64: 592, 128>}, {pipeline_mode = #tpu.pipeline_mode<synchronous>, transform_indices = @transform_2, window_bounds = array<i64: 8, 128>}, {transform_indices = @transform_3, window_bounds = array<i64: 16, 3>}]} {
    %c0 = arith.constant 0 : index
    %c0_0 = arith.constant 0 : index
    %0 = vector.load %arg1[%c0, %c0_0] : memref<16x80xbf16, #tpu.memory_space<vmem>>, vector<16x80xbf16>
    %c0_1 = arith.constant 0 : index
    %c0_2 = arith.constant 0 : index
    %1 = vector.load %arg2[%c0_1, %c0_2] : memref<592x128xbf16, #tpu.memory_space<vmem>>, vector<80x128xbf16>
    %cst = arith.constant dense<0.000000e+00> : vector<16x128xf32>
    %2 = tpu.matmul %0, %1, %cst {dimension_numbers = #tpu.dot_dimension_numbers<[1], [0], [0], [1], [0, 0, 1, 1], [], []>} : vector<16x80xbf16>, vector<80x128xbf16>, vector<16x128xf32> -> vector<16x128xf32>
    %c0_3 = arith.constant 0 : index
    %c0_4 = arith.constant 0 : index
    %3 = vector.load %arg3[%c0_3, %c0_4] : memref<8x128xf32, #tpu.memory_space<vmem>>, vector<1x128xf32>
    %4 = vector.broadcast %3 : vector<1x128xf32> to vector<16x128xf32>
    %5 = arith.addf %2, %4 : vector<16x128xf32>
    %cst_5 = arith.constant 0.000000e+00 : f32
    %6 = vector.broadcast %cst_5 : f32 to vector<16x128xf32>
    %7 = arith.maximumf %5, %6 : vector<16x128xf32>
    %8 = arith.truncf %7 : vector<16x128xf32> to vector<16x128xbf16>
    %c80 = arith.constant 80 : index
    %c0_6 = arith.constant 0 : index
    %9 = vector.load %arg2[%c80, %c0_6] : memref<592x128xbf16, #tpu.memory_space<vmem>>, vector<128x128xbf16>
    %cst_7 = arith.constant dense<0.000000e+00> : vector<16x128xf32>
    %10 = tpu.matmul %8, %9, %cst_7 {dimension_numbers = #tpu.dot_dimension_numbers<[1], [0], [0], [1], [0, 0, 1, 1], [], []>} : vector<16x128xbf16>, vector<128x128xbf16>, vector<16x128xf32> -> vector<16x128xf32>
    %c1 = arith.constant 1 : index
    %c0_8 = arith.constant 0 : index
    %11 = vector.load %arg3[%c1, %c0_8] : memref<8x128xf32, #tpu.memory_space<vmem>>, vector<1x128xf32>
    %12 = vector.broadcast %11 : vector<1x128xf32> to vector<16x128xf32>
    %13 = arith.addf %10, %12 : vector<16x128xf32>
    %cst_9 = arith.constant 0.000000e+00 : f32
    %14 = vector.broadcast %cst_9 : f32 to vector<16x128xf32>
    %15 = arith.maximumf %13, %14 : vector<16x128xf32>
    %16 = arith.truncf %15 : vector<16x128xf32> to vector<16x128xbf16>
    %c208 = arith.constant 208 : index
    %c0_10 = arith.constant 0 : index
    %17 = vector.load %arg2[%c208, %c0_10] : memref<592x128xbf16, #tpu.memory_space<vmem>>, vector<128x128xbf16>
    %cst_11 = arith.constant dense<0.000000e+00> : vector<16x128xf32>
    %18 = tpu.matmul %16, %17, %cst_11 {dimension_numbers = #tpu.dot_dimension_numbers<[1], [0], [0], [1], [0, 0, 1, 1], [], []>} : vector<16x128xbf16>, vector<128x128xbf16>, vector<16x128xf32> -> vector<16x128xf32>
    %c2 = arith.constant 2 : index
    %c0_12 = arith.constant 0 : index
    %19 = vector.load %arg3[%c2, %c0_12] : memref<8x128xf32, #tpu.memory_space<vmem>>, vector<1x128xf32>
    %20 = vector.broadcast %19 : vector<1x128xf32> to vector<16x128xf32>
    %21 = arith.addf %18, %20 : vector<16x128xf32>
    %cst_13 = arith.constant 0.000000e+00 : f32
    %22 = vector.broadcast %cst_13 : f32 to vector<16x128xf32>
    %23 = arith.maximumf %21, %22 : vector<16x128xf32>
    %24 = arith.truncf %23 : vector<16x128xf32> to vector<16x128xbf16>
    %c336 = arith.constant 336 : index
    %c0_14 = arith.constant 0 : index
    %25 = vector.load %arg2[%c336, %c0_14] : memref<592x128xbf16, #tpu.memory_space<vmem>>, vector<128x128xbf16>
    %cst_15 = arith.constant dense<0.000000e+00> : vector<16x128xf32>
    %26 = tpu.matmul %24, %25, %cst_15 {dimension_numbers = #tpu.dot_dimension_numbers<[1], [0], [0], [1], [0, 0, 1, 1], [], []>} : vector<16x128xbf16>, vector<128x128xbf16>, vector<16x128xf32> -> vector<16x128xf32>
    %c3 = arith.constant 3 : index
    %c0_16 = arith.constant 0 : index
    %27 = vector.load %arg3[%c3, %c0_16] : memref<8x128xf32, #tpu.memory_space<vmem>>, vector<1x128xf32>
    %28 = vector.broadcast %27 : vector<1x128xf32> to vector<16x128xf32>
    %29 = arith.addf %26, %28 : vector<16x128xf32>
    %cst_17 = arith.constant 0.000000e+00 : f32
    %30 = vector.broadcast %cst_17 : f32 to vector<16x128xf32>
    %31 = arith.maximumf %29, %30 : vector<16x128xf32>
    %32 = arith.truncf %31 : vector<16x128xf32> to vector<16x128xbf16>
    %c464 = arith.constant 464 : index
    %c0_18 = arith.constant 0 : index
    %33 = vector.load %arg2[%c464, %c0_18] : memref<592x128xbf16, #tpu.memory_space<vmem>>, vector<128x128xbf16>
    %cst_19 = arith.constant dense<0.000000e+00> : vector<16x128xf32>
    %34 = tpu.matmul %32, %33, %cst_19 {dimension_numbers = #tpu.dot_dimension_numbers<[1], [0], [0], [1], [0, 0, 1, 1], [], []>} : vector<16x128xbf16>, vector<128x128xbf16>, vector<16x128xf32> -> vector<16x128xf32>
    %c4 = arith.constant 4 : index
    %c0_20 = arith.constant 0 : index
    %35 = vector.load %arg3[%c4, %c0_20] : memref<8x128xf32, #tpu.memory_space<vmem>>, vector<1x128xf32>
    %36 = vector.broadcast %35 : vector<1x128xf32> to vector<16x128xf32>
    %37 = arith.addf %34, %36 : vector<16x128xf32>
    %cst_21 = arith.constant 0.000000e+00 : f32
    %38 = vector.broadcast %cst_21 : f32 to vector<16x128xf32>
    %39 = arith.subf %38, %37 : vector<16x128xf32>
    %40 = math.exp %39 : vector<16x128xf32>
    %cst_22 = arith.constant 1.000000e+00 : f32
    %41 = vector.broadcast %cst_22 : f32 to vector<16x128xf32>
    %42 = arith.addf %41, %40 : vector<16x128xf32>
    %43 = tpu.reciprocal %42 {approx = true} : vector<16x128xf32> -> vector<16x128xf32>
    %44 = vector.extract_strided_slice %43 {offsets = [0, 0], sizes = [16, 3], strides = [1, 1]} : vector<16x128xf32> to vector<16x3xf32>
    %c0_23 = arith.constant 0 : index
    %c0_24 = arith.constant 0 : index
    %45 = vector.load %arg4[%c0_23, %c0_24] : memref<16x3xf32, #tpu.memory_space<vmem>>, vector<16x3xf32>
    tpu.vector_store %arg4[%c0_23, %c0_24], %44 {strides = array<i32>} : memref<16x3xf32, #tpu.memory_space<vmem>>, vector<16x3xf32>,
    return
  }
  func.func @transform_0(%arg0: i32) -> (i32, i32) {
    %c0_i32 = arith.constant 0 : i32
    %c0_i32_0 = arith.constant 0 : i32
    return %arg0, %c0_i32 : i32, i32
  }
  func.func @transform_1(%arg0: i32) -> (i32, i32) {
    %c0_i32 = arith.constant 0 : i32
    %c0_i32_0 = arith.constant 0 : i32
    %c0_i32_1 = arith.constant 0 : i32
    return %c0_i32, %c0_i32_0 : i32, i32
  }
  func.func @transform_2(%arg0: i32) -> (i32, i32) {
    %c0_i32 = arith.constant 0 : i32
    %c0_i32_0 = arith.constant 0 : i32
    %c0_i32_1 = arith.constant 0 : i32
    return %c0_i32, %c0_i32_0 : i32, i32
  }
  func.func @transform_3(%arg0: i32) -> (i32, i32) {
    %c0_i32 = arith.constant 0 : i32
    %c0_i32_0 = arith.constant 0 : i32
    return %arg0, %c0_i32 : i32, i32
  }
}

</mosaic_0001>

<bundles_post_ra>
// kernel: tpu_custom_call.1
= control target key start
LH: loop header
LB: loop body
LE: loop exit
PB: predicated region body
PF: predicated region fallthrough
CT: control target
= control target key end

     0   :  { %8 = vsyncpa [#allocation3], 0  ;;  %s1008_s0 = inlined_call_operand.hbm [shape: bf16[16,80], index: 0, kind: input, shape index: {}]   ;;  %s1009_s1 = inlined_call_operand.hbm [shape: bf16[592,128], index: 1, kind: input, shape index: {}]   ;;  %s1010_s2 = inlined_call_operand.hbm [shape: f32[8,128], index: 2, kind: input, shape index: {}]   ;;  %s1011_s3 = inlined_call_operand.vmem [shape: f32[16,3], index: 3, kind: output, shape index: {}]  }
   0x1   :  { %9 = vsyncpa [#allocation5], 0  ;;  %s919_s12 = smov [#allocation4]   ;;  %s920_s14 = smov [#allocation2]  }
   0x2   :  { %s27_s13 = sshll.u32 %s919_s12, 4  ;;  %s15_s15 = sshll.u32 %s920_s14, 4  ;;  %s28_s13 = int_to_ptr.vmem [resolvable:$true] %s27_s13  ;;  %s16_s15 = int_to_ptr.vmem [resolvable:$true] %s15_s15 }
   0x3   :  { %s863_s16 = scalar_lea.vmem %s28_s13, 4736  ;;  %p868_p1 = scmp.lt.s32.totalorder %s28_s13, %s28_s13 }
   0x4   :  { %p864_p0 = scmp.ne.s32.totalorder %s28_s13, %s863_s16  ;;  %p869_p2 = scmp.lt.s32.totalorder %s863_s16, %s863_s16 }
   0x6   :  { %p870_p3 = por %p869_p2, %p868_p1 }
   0x8   :  { %p871_p4 = pnand %p870_p3, %p864_p0 }
   0xa   :  { %874 = shalt.err (!%p871_p4)
}
   0xb   :  { %s921_s17 = smov 64   ;;  %s922_s18 = smov 4  }
   0xc   :  { %33 = dma.hbm_to_vmem [thread:$0]  %s1009_s1, 4736, %s28_s13, [#allocation5], %s921_s17, %s921_s17, %s922_s18  }
   0xd   :  { %s883_s21 = scalar_lea.vmem %s16_s15, 128  ;;  %p888_p6 = scmp.lt.s32.totalorder %s16_s15, %s16_s15 }
   0xe   :  { %p884_p5 = scmp.ne.s32.totalorder %s16_s15, %s883_s21  ;;  %p889_p7 = scmp.lt.s32.totalorder %s883_s21, %s883_s21 }
  0x10   :  { %p890_p8 = por %p889_p7, %p888_p6 }
  0x12   :  { %p891_p9 = pnand %p890_p8, %p884_p5 }
  0x14   :  { %894 = shalt.err (!%p891_p9)
}
  0x15   :  { %21 = dma.hbm_to_vmem [thread:$0]  %s1008_s0, 128, %s16_s15, [#allocation3], %s921_s17, %s921_s17, %s922_s18  }
  0x16   :  { %s923_s24 = smov [#allocation6]  }
  0x17   :  { %s40_s25 = sshll.u32 %s923_s24, 4  ;;  %s41_s25 = int_to_ptr.vmem [resolvable:$true] %s40_s25 }
  0x18   :  { %s903_s26 = scalar_lea.vmem %s41_s25, 128  ;;  %p908_p11 = scmp.lt.s32.totalorder %s41_s25, %s41_s25 }
  0x19   :  { %p904_p10 = scmp.ne.s32.totalorder %s41_s25, %s903_s26  ;;  %p909_p12 = scmp.lt.s32.totalorder %s903_s26, %s903_s26 }
  0x1b   :  { %p910_p13 = por %p909_p12, %p908_p11 }
  0x1d   :  { %p911_p0 = pnand %p910_p13, %p904_p10 }
  0x1f   :  { %914 = shalt.err (!%p911_p0)
}
  0x20   :  { %43 = dma.hbm_to_vmem [thread:$0]  %s1010_s2, 128, %s41_s25, [#allocation5]  }
  0x21   :  { %915 = dma.done.wait [#allocation3], 128  }
  0x22   :  { %916 = vsyncadd [#allocation3], 4294967168 }
  0x23   :  { %917 = dma.done.wait [#allocation5], 4864  }
  0x24   :  { %918 = vsyncadd [#allocation5], 4294962432  ;;  %v924_v0 = vmov 0.0   ;;  %vm925_vm0 = vmmov 0   ;;  %v809_v1 = vld [vmem:[#allocation4 + $0x20] sm:$0xff]   ;;  %v810_v2 = vld [vmem:[#allocation4 + $0x18] sm:$0xff]  }
  0x25   :  { %708 = vmatprep.subr.bf16.mxu0 %v924_v0  ;;  %718 = vmatprep.mubr.msk.bf16.mxu0 %vm925_vm0, %v924_v0  ;;  %v811_v3 = vld [vmem:[#allocation4 + $0x10] sm:$0xff]   ;;  %v815_v4 = vld [vmem:[#allocation4 + $0x60] sm:$0xff]   ;;  %v816_v5 = vld [vmem:[#allocation4 + $0x58] sm:$0xff]   ;;  %vm106_vm1 = vcmask 654336   ;;  %vm613_vm2 = vcmask 23552  }
  0x26   :  { %722 = vmatprep.subr.bf16.mxu1 %v924_v0  ;;  %738 = vmatprep.mubr.msk.bf16.mxu1 %vm925_vm0, %v924_v0  ;;  %v812_v6 = vld [vmem:[#allocation4 + $0x8] sm:$0xff]   ;;  %v817_v7 = vld [vmem:[#allocation4 + $0x50] sm:$0xff]   ;;  %v813_v8 = vld [vmem:[#allocation4] sm:$0xff]  }
  0x27   :  { %709 = vmatpush3.bf16.msra.mxu0 %v809_v1  ;;  %723 = vmatpush3.bf16.msra.mxu1 %v815_v4  ;;  %v818_v9 = vld [vmem:[#allocation4 + $0x48] sm:$0xff]   ;;  %v814_v10 = vld [vmem:[#allocation2] sm:$0xff]   ;;  %v819_v11 = vld [vmem:[#allocation4 + $0x40] sm:$0xff]  }
  0x28   :  { %710 = vmatprep.subr.bf16.mxu0 %v924_v0  ;;  %724 = vmatprep.subr.bf16.mxu1 %v924_v0  ;;  %v820_v12 = vld [vmem:[#allocation4 + $0x38] sm:$0xff]   ;;  %v821_v13 = vld [vmem:[#allocation4 + $0x30] sm:$0xff]   ;;  %v822_v14 = vld [vmem:[#allocation4 + $0x28] sm:$0xff]  }
  0x29   :  { %v823_v15 = vld [vmem:[#allocation4 + $0xa0] sm:$0xff]   ;;  %v824_v16 = vld [vmem:[#allocation4 + $0x98] sm:$0xff]   ;;  %v825_v17 = vld [vmem:[#allocation4 + $0x90] sm:$0xff]  }
  0x2a   :  { %v826_v18 = vld [vmem:[#allocation4 + $0x88] sm:$0xff]   ;;  %v827_v19 = vld [vmem:[#allocation4 + $0x80] sm:$0xff]   ;;  %v828_v30 = vld [vmem:[#allocation4 + $0x78] sm:$0xff]  }
  0x2b   :  { %711 = vmatpush3.bf16.msra.mxu0 %v810_v2  ;;  %725 = vmatpush3.bf16.msra.mxu1 %v816_v5  ;;  %v622_v20 = vld [vmem:[#allocation6] ss:$0 sm:$0xff]  ;;  %v829_v31 = vld [vmem:[#allocation4 + $0x70] sm:$0xff]   ;;  %v831_v33 = vld [vmem:[#allocation4 + $0xe0] sm:$0xff]  }
  0x2c   :  { %712 = vmatprep.subr.bf16.mxu0 %v924_v0  ;;  %726 = vmatprep.subr.bf16.mxu1 %v924_v0  ;;  %v830_v32 = vld [vmem:[#allocation4 + $0x68] sm:$0xff]   ;;  %v832_v34 = vld [vmem:[#allocation4 + $0xd8] sm:$0xff]   ;;  %v833_v35 = vld [vmem:[#allocation4 + $0xd0] sm:$0xff]  }
  0x2d   :  { %v834_v36 = vld [vmem:[#allocation4 + $0xc8] sm:$0xff]   ;;  %v835_v37 = vld [vmem:[#allocation4 + $0xc0] sm:$0xff]   ;;  %v836_v48 = vld [vmem:[#allocation4 + $0xb8] sm:$0xff]  }
  0x2e   :  { %v630_v38 = vld [vmem:[#allocation6 + $0x1] ss:$0 sm:$0xff]  ;;  %v837_v49 = vld [vmem:[#allocation4 + $0xb0] sm:$0xff]   ;;  %v839_v51 = vld [vmem:[#allocation4 + $0x120] sm:$0xff]  }
  0x2f   :  { %713 = vmatpush3.bf16.msra.mxu0 %v811_v3  ;;  %727 = vmatpush3.bf16.msra.mxu1 %v817_v7  ;;  %v838_v50 = vld [vmem:[#allocation4 + $0xa8] sm:$0xff]   ;;  %v840_v52 = vld [vmem:[#allocation4 + $0x118] sm:$0xff]   ;;  %v841_v53 = vld [vmem:[#allocation4 + $0x110] sm:$0xff]  }
  0x30   :  { %714 = vmatprep.subr.bf16.mxu0 %v924_v0  ;;  %728 = vmatprep.subr.bf16.mxu1 %v924_v0  ;;  %v842_v54 = vld [vmem:[#allocation4 + $0x108] sm:$0xff]   ;;  %v843_v55 = vld [vmem:[#allocation4 + $0x100] sm:$0xff]   ;;  %v844_v3 = vld [vmem:[#allocation4 + $0xf8] sm:$0xff]  }
  0x31   :  { %v639_v56 = vld [vmem:[#allocation6 + $0x2] ss:$0 sm:$0xff]  ;;  %v845_v4 = vld [vmem:[#allocation4 + $0xf0] sm:$0xff]  }
  0x32   :  { %v846_v5 = vld [vmem:[#allocation4 + $0xe8] sm:$0xff]  }
  0x33   :  { %715 = vmatpush3.bf16.msra.mxu0 %v812_v6  ;;  %729 = vmatpush3.bf16.msra.mxu1 %v818_v9  ;;  %v648_v6 = vld [vmem:[#allocation6 + $0x3] ss:$0 sm:$0xff] }
  0x34   :  { %716 = vmatprep.subr.bf16.mxu0 %v924_v0  ;;  %730 = vmatprep.subr.bf16.mxu1 %v924_v0 }
  0x37   :  { %717 = vmatpush3.bf16.msra.mxu0 %v813_v8  ;;  %731 = vmatpush3.bf16.msra.mxu1 %v819_v11 }
  0x38   :  { %742 = vmatprep.subr.bf16.mxu0 %v924_v0  ;;  %732 = vmatprep.subr.bf16.mxu1 %v924_v0 }
  0x3a   :  { %719 = vmatmul.mubr.msk.bf16.vlgmr.msra.gmra.mxu0 %vm106_vm1, %v814_v10 }
  0x3b   :  { %758 = vmatprep.mubr.msk.bf16.mxu0 %vm925_vm0, %v924_v0  ;;  %733 = vmatpush3.bf16.msra.mxu1 %v820_v12 }
  0x3c   :  { %734 = vmatprep.subr.bf16.mxu1 %v924_v0  ;;  %743 = vmatpush3.bf16.msra.mxu0 %v823_v15 }
  0x3d   :  { %744 = vmatprep.subr.bf16.mxu0 %v924_v0 }
  0x3f   :  { %735 = vmatpush3.bf16.msra.mxu1 %v821_v13 }
  0x40   :  { %736 = vmatprep.subr.bf16.mxu1 %v924_v0  ;;  %745 = vmatpush3.bf16.msra.mxu0 %v824_v16  ;;  %v657_v16 = vld [vmem:[#allocation6 + $0x4] ss:$0 sm:$0xff] }
  0x41   :  { %746 = vmatprep.subr.bf16.mxu0 %v924_v0 }
  0x43   :  { %737 = vmatpush3.bf16.msra.mxu1 %v822_v14 }
  0x44   :  { %762 = vmatprep.subr.bf16.mxu1 %v924_v0  ;;  %747 = vmatpush3.bf16.msra.mxu0 %v825_v17 }
  0x45   :  { %748 = vmatprep.subr.bf16.mxu0 %v924_v0 }
  0x48   :  { %749 = vmatpush3.bf16.msra.mxu0 %v826_v18 }
  0x49   :  { %750 = vmatprep.subr.bf16.mxu0 %v924_v0 }
  0x4c   :  { %751 = vmatpush3.bf16.msra.mxu0 %v827_v19 }
  0x4d   :  { %752 = vmatprep.subr.bf16.mxu0 %v924_v0 }
  0x50   :  { %753 = vmatpush3.bf16.msra.mxu0 %v828_v30 }
  0x51   :  { %754 = vmatprep.subr.bf16.mxu0 %v924_v0 }
  0x54   :  { %755 = vmatpush3.bf16.msra.mxu0 %v829_v31 }
  0x55   :  { %756 = vmatprep.subr.bf16.mxu0 %v924_v0 }
  0x58   :  { %757 = vmatpush3.bf16.msra.mxu0 %v830_v32 }
  0x59   :  { %782 = vmatprep.subr.bf16.mxu0 %v924_v0 }
  0xfa   :  { %v144_v21 = vpop.f32.mrf.mxu0 }
  0xfb   :  { %v145_v23 = vadd.f32 %v622_v20, %v144_v21 }
  0xfc   :  { %v720_v22 = vpop.f32.mrf.mxu0 }
  0xfd   :  { %v151_v27 = vmax.f32 %v145_v23, 0.0 }
  0xfe   :  { %v147_v24 = vpop.f32.mrf.mxu0 }
  0xff   :  { %v148_v25 = vadd.f32 %v622_v20, %v147_v24 }
 0x100   :  { %v721_v26 = vpop.f32.mrf.mxu0 }
 0x101   :  { %v152_v28 = vmax.f32 %v148_v25, 0.0 }
 0x103   :  { %v153_v29 = vpack.c.bf16 %v152_v28, %v151_v27 }
 0x105   :  { %739 = vmatmul.mubr.bf16.vlgmr.msra.gmra.mxu1 %v153_v29 }
 0x106   :  { %778 = vmatprep.mubr.msk.bf16.mxu1 %vm925_vm0, %v924_v0  ;;  %763 = vmatpush3.bf16.msra.mxu1 %v831_v33 }
 0x107   :  { %764 = vmatprep.subr.bf16.mxu1 %v924_v0 }
 0x10a   :  { %765 = vmatpush3.bf16.msra.mxu1 %v832_v34 }
 0x10b   :  { %766 = vmatprep.subr.bf16.mxu1 %v924_v0 }
 0x10e   :  { %767 = vmatpush3.bf16.msra.mxu1 %v833_v35 }
 0x10f   :  { %768 = vmatprep.subr.bf16.mxu1 %v924_v0 }
 0x112   :  { %769 = vmatpush3.bf16.msra.mxu1 %v834_v36 }
 0x113   :  { %770 = vmatprep.subr.bf16.mxu1 %v924_v0 }
 0x116   :  { %771 = vmatpush3.bf16.msra.mxu1 %v835_v37 }
 0x117   :  { %772 = vmatprep.subr.bf16.mxu1 %v924_v0 }
 0x11a   :  { %773 = vmatpush3.bf16.msra.mxu1 %v836_v48 }
 0x11b   :  { %774 = vmatprep.subr.bf16.mxu1 %v924_v0 }
 0x11e   :  { %775 = vmatpush3.bf16.msra.mxu1 %v837_v49 }
 0x11f   :  { %776 = vmatprep.subr.bf16.mxu1 %v924_v0 }
 0x122   :  { %777 = vmatpush3.bf16.msra.mxu1 %v838_v50 }
 0x1c5   :  { %v257_v39 = vpop.f32.mrf.mxu1 }
 0x1c6   :  { %v258_v41 = vadd.f32 %v630_v38, %v257_v39 }
 0x1c7   :  { %v740_v40 = vpop.f32.mrf.mxu1 }
 0x1c8   :  { %v264_v45 = vmax.f32 %v258_v41, 0.0 }
 0x1c9   :  { %v260_v42 = vpop.f32.mrf.mxu1 }
 0x1ca   :  { %v261_v43 = vadd.f32 %v630_v38, %v260_v42 }
 0x1cb   :  { %v741_v44 = vpop.f32.mrf.mxu1 }
 0x1cc   :  { %v265_v46 = vmax.f32 %v261_v43, 0.0 }
 0x1ce   :  { %v266_v47 = vpack.c.bf16 %v265_v46, %v264_v45 }
 0x1d0   :  { %759 = vmatmul.mubr.bf16.vlgmr.msra.gmra.mxu0 %v266_v47 }
 0x1d1   :  { %798 = vmatprep.mubr.msk.bf16.mxu0 %vm925_vm0, %v924_v0  ;;  %783 = vmatpush3.bf16.msra.mxu0 %v839_v51 }
 0x1d2   :  { %784 = vmatprep.subr.bf16.mxu0 %v924_v0 }
 0x1d5   :  { %785 = vmatpush3.bf16.msra.mxu0 %v840_v52 }
 0x1d6   :  { %786 = vmatprep.subr.bf16.mxu0 %v924_v0 }
 0x1d9   :  { %787 = vmatpush3.bf16.msra.mxu0 %v841_v53 }
 0x1da   :  { %788 = vmatprep.subr.bf16.mxu0 %v924_v0 }
 0x1dd   :  { %789 = vmatpush3.bf16.msra.mxu0 %v842_v54 }
 0x1de   :  { %790 = vmatprep.subr.bf16.mxu0 %v924_v0 }
 0x1e1   :  { %791 = vmatpush3.bf16.msra.mxu0 %v843_v55 }
 0x1e2   :  { %792 = vmatprep.subr.bf16.mxu0 %v924_v0 }
 0x1e5   :  { %793 = vmatpush3.bf16.msra.mxu0 %v844_v3 }
 0x1e6   :  { %794 = vmatprep.subr.bf16.mxu0 %v924_v0 }
 0x1e9   :  { %795 = vmatpush3.bf16.msra.mxu0 %v845_v4 }
 0x1ea   :  { %796 = vmatprep.subr.bf16.mxu0 %v924_v0 }
 0x1ed   :  { %797 = vmatpush3.bf16.msra.mxu0 %v846_v5 }
 0x290   :  { %v370_v57 = vpop.f32.mrf.mxu0 }
 0x291   :  { %v371_v59 = vadd.f32 %v639_v56, %v370_v57 }
 0x292   :  { %v760_v58 = vpop.f32.mrf.mxu0 }
 0x293   :  { %v377_v63 = vmax.f32 %v371_v59, 0.0 }
 0x294   :  { %v373_v60 = vpop.f32.mrf.mxu0 }
 0x295   :  { %v374_v61 = vadd.f32 %v639_v56, %v373_v60 }
 0x296   :  { %v761_v62 = vpop.f32.mrf.mxu0 }
 0x297   :  { %v378_v1 = vmax.f32 %v374_v61, 0.0 }
 0x299   :  { %v379_v2 = vpack.c.bf16 %v378_v1, %v377_v63 }
 0x29b   :  { %779 = vmatmul.mubr.bf16.vlgmr.msra.gmra.mxu1 %v379_v2 }
 0x35b   :  { %v483_v7 = vpop.f32.mrf.mxu1 }
 0x35c   :  { %v484_v9 = vadd.f32 %v648_v6, %v483_v7 }
 0x35d   :  { %v780_v8 = vpop.f32.mrf.mxu1 }
 0x35e   :  { %v490_v13 = vmax.f32 %v484_v9, 0.0 }
 0x35f   :  { %v486_v10 = vpop.f32.mrf.mxu1 }
 0x360   :  { %v487_v11 = vadd.f32 %v648_v6, %v486_v10 }
 0x361   :  { %v781_v12 = vpop.f32.mrf.mxu1 }
 0x362   :  { %v491_v14 = vmax.f32 %v487_v11, 0.0 }
 0x364   :  { %v492_v15 = vpack.c.bf16 %v491_v14, %v490_v13 }
 0x366   :  { %799 = vmatmul.mubr.bf16.vlgmr.msra.gmra.mxu0 %v492_v15 }
 0x426   :  { %v596_v17 = vpop.f32.mrf.mxu0 }
 0x427   :  { %v597_v18 = vadd.f32 %v657_v16, %v596_v17 }
 0x428   :  { %v800_v19 = vpop.f32.mrf.mxu0 }
 0x429   :  { %v603_v20 = vsub.f32 0.0, %v597_v18 }
 0x42a   :  { %v599_v21 = vpop.f32.mrf.mxu0 }
 0x42b   :  { %v605_v0 = vmul.f32 1.442695, %v603_v20  ;;  %v600_v22 = vadd.f32 %v657_v16, %v599_v21 }
 0x42c   :  { %v801_v23 = vpop.f32.mrf.mxu0 }
 0x42d   :  { %847 = vpow2.f32 %v605_v0  ;;  %v604_v24 = vsub.f32 0.0, %v600_v22 }
 0x42f   :  { %v607_v25 = vmul.f32 1.442695, %v604_v24 }
 0x431   :  { %849 = vpow2.f32 %v607_v25 }
 0x43a   :  { %v848_v26 = vpop.eup %847 }
 0x43b   :  { %v609_v27 = vadd.f32 1.0, %v848_v26 }
 0x43d   :  { %851 = vrcp.f32 %v609_v27 }
 0x43e   :  { %v850_v28 = vpop.eup %849 }
 0x43f   :  { %v610_v29 = vadd.f32 1.0, %v850_v28 }
 0x441   :  { %853 = vrcp.f32 %v610_v29 }
 0x44a   :  { %v852_v30 = vpop.eup %851 }
 0x44b   :  { %614 = vst.msk [vmem:[%s1011_s3] sm:$0xff] %vm613_vm2, %v852_v30 }
 0x44e   :  { %v854_v31 = vpop.eup %853 }
 0x44f   :  { %615 = vst.msk [vmem:[%s1011_s3 + $0x8] sm:$0xff] %vm613_vm2, %v854_v31 }
 0x450   :  { %620 = vsyncpa [#allocation3], 1 }
 0x451   :  { %621 = vsyncpa [#allocation5], 1 }

</bundles_post_ra>
